<compile_context>
chip_gen: v6e
topology: v6e:2x2x1
jax: 0.10.0
libtpu: 0.0.40
codegen_flags: <defaults>
</compile_context>

<pallas_src>
import functools

import jax
import jax.numpy as jnp
from jax import lax
from jax.experimental import pallas as pl
from jax.experimental.pallas import tpu as pltpu


def _round_up(x, m):
    return (x + m - 1) // m * m


def _cdiv(a, b):
    return (a + b - 1) // b


# ----------------------------------------------------------------------------
# Per-generation VMEM sizing
# ----------------------------------------------------------------------------
@functools.lru_cache(maxsize=None)
def _vmem_budget():
    """Returns (block_budget_bytes, vmem_limit_bytes), gated per TPU generation."""
    try:
        info = pltpu.get_tpu_info()
        vmem = int(getattr(info, "vmem_capacity_bytes"))
        budget = min(vmem * 3 // 8, 48 * 1024 * 1024)   # v5e/v6e: 48 MiB, v7x: 24 MiB
        limit = min(vmem * 3 // 4, 96 * 1024 * 1024)    # v5e/v6e: 96 MiB, v7x: 48 MiB
        budget = max(budget, 8 * 1024 * 1024)
        limit = max(limit, budget + 8 * 1024 * 1024)
        return budget, limit
    except Exception:
        # Conservative defaults (fit v5e's 16 MiB default scoped VMEM comfortably).
        return 12 * 1024 * 1024, 32 * 1024 * 1024


# ----------------------------------------------------------------------------
# One-time probe: dynamic, per-sublane-strided pltpu.roll behaves like jnp.roll
# (including shift amounts >= the axis size).  If not, fall back to XLA skew.
# ----------------------------------------------------------------------------
@functools.lru_cache(maxsize=None)
def _fused_roll_supported():
    def _probe(width):
        rows = 16
        base_off = width // 2 + 1
        n_t = _cdiv(2 * width, rows) + 2     # covers amounts up to > 2*width

        def kern(x_ref, o_ref):
            base = pl.program_id(0) * rows + base_off
            o_ref[0] = pltpu.roll(x_ref[0], base, 1, stride=1, stride_axis=0)

        x = (jnp.arange(width, dtype=jnp.float32)[None, None, :]
             + 1000.0 * jnp.arange(rows, dtype=jnp.float32)[None, :, None]
             + jnp.zeros((n_t, 1, 1), jnp.float32))
        out = pl.pallas_call(
            kern,
            out_shape=jax.ShapeDtypeStruct((n_t, rows, width), jnp.float32),
            grid=(n_t,),
            in_specs=[pl.BlockSpec((1, rows, width), lambda i: (i, 0, 0))],
            out_specs=pl.BlockSpec((1, rows, width), lambda i: (i, 0, 0)),
        )(x)
        out = jax.block_until_ready(out)
        amount = (jnp.arange(n_t)[:, None, None] * rows
                  + jnp.arange(rows)[None, :, None] + base_off)
        src = (jnp.arange(width)[None, None, :] - amount) % width
        expected = jnp.take_along_axis(x, jnp.broadcast_to(src, x.shape), axis=-1)
        return bool(jnp.array_equal(out, expected))

    try:
        return _probe(128) and _probe(256)
    except Exception:
        return False


# ----------------------------------------------------------------------------
# Kernel factory
# ----------------------------------------------------------------------------
def _make_kernel(*, has_bias, roll_params):
    # roll_params: None  -> store relative-layout logits (width Mp)
    #              (L, Mp, out_width, row_tile) -> fuse the rel->abs skew via roll.
    def kernel(q_ref, e_ref, *rest):
        if has_bias:
            bias_ref, out_ref = rest
        else:
            (out_ref,) = rest
        # q_ref: (1, TL, Dp) bf16; e_ref: (1, Dp, Mp) bf16 (pre-transposed in XLA).
        logits = lax.dot_general(
            q_ref[0], e_ref[0],
            dimension_numbers=(((1,), (0,)), ((), ())),
            preferred_element_type=jnp.float32)            # (TL, Mp) f32
        if has_bias:
            logits = logits + bias_ref[...]                # (1, Mp) broadcast add
        if roll_params is None:
            out_ref[0] = logits.astype(out_ref.dtype)
        else:
            length, m_pad, out_w, row_tile = roll_params
            # out[row, j] = logits[row, j + (length-1) - q], q = r0 + row.
            # In jnp.roll convention the per-row amount is (q - (length-1)) mod Mp;
            # use the non-negative base r0 + Mp - (length-1) (Mp >= length-1).
            r0 = pl.program_id(2) * row_tile
            base = r0 + (m_pad - (length - 1))
            rolled = pltpu.roll(logits, base, 1, stride=1, stride_axis=0)
            out_ref[0] = rolled[:, :out_w].astype(out_ref.dtype)
    return kernel


# ----------------------------------------------------------------------------
# Tile sizing
# ----------------------------------------------------------------------------
def _choose_row_tile(length, d_pad, m_pad, out_width, out_itemsize, *,
                     has_bias, budget, vmem_limit, max_row_tile=None):
    # Double-buffered accounting: resident E (+ bias) blocks + per-row Q/out blocks.
    fixed = 2 * (d_pad * m_pad * 2) + (2 * m_pad * 4 if has_bias else 0)
    per_row = 2 * (d_pad * 2) + 2 * (out_width * out_itemsize)
    if fixed + 16 * per_row > vmem_limit:
        raise ValueError(
            "LearnedRelativePositionalEmbedding Pallas kernel: resident embedding "
            f"block needs ~{fixed + 16 * per_row} bytes which exceeds the VMEM limit "
            f"({vmem_limit} bytes); sequence length / embed dim too large. "
            "TODO(synk): add an Mp-tiled (third 'arbitrary' grid axis) fallback.")
    avail = budget - fixed
    tile = avail // per_row if avail > 0 else 16
    tile = max(16, min(1024, (tile // 16) * 16))
    if max_row_tile is not None:
        tile = max(16, min(tile, _round_up(max_row_tile, 16)))
    l16 = _round_up(length, 16)
    tile = min(tile, l16)
    # Balance tiles so remainder padding is < 16 rows instead of < tile rows.
    n_tiles = _cdiv(l16, tile)
    tile = _round_up(_cdiv(l16, n_tiles), 16)
    n_tiles = _cdiv(l16, tile)
    return tile, n_tiles * tile


# ----------------------------------------------------------------------------
# pallas_call wrapper
# ----------------------------------------------------------------------------
def _positional_logits_pallas(q, e, bias, *, out_width, out_dtype, row_tile,
                              roll_params, vmem_limit, cost):
    """q: (BH, Lp, Dp) bf16; e: (He, Dp, Mp) bf16; bias: (1, Mp) f32 or None.
    Query row b*He + h uses embedding head h.  Grid = (head, batch, L-tile) so the
    per-head E block is DMA'd only He times."""
    BH, Lp, Dp = q.shape
    He, _, Mp = e.shape
    assert BH % He == 0
    Bh = BH // He
    n_tiles = Lp // row_tile

    kernel = _make_kernel(has_bias=bias is not None, roll_params=roll_params)

    in_specs = [
        pl.BlockSpec((1, row_tile, Dp), lambda h, b, i: (b * He + h, i, 0)),   # Q tile
        pl.BlockSpec((1, Dp, Mp), lambda h, b, i: (h, 0, 0)),                  # E (per head)
    ]
    args = [q, e]
    if bias is not None:
        in_specs.append(pl.BlockSpec((1, Mp), lambda h, b, i: (0, 0)))         # bias
        args.append(bias)

    return pl.pallas_call(
        kernel,
        out_shape=jax.ShapeDtypeStruct((BH, Lp, out_width), out_dtype),
        grid=(He, Bh, n_tiles),
        in_specs=in_specs,
        out_specs=pl.BlockSpec((1, row_tile, out_width),
                               lambda h, b, i: (b * He + h, i, 0)),
        compiler_params=pltpu.CompilerParams(
            dimension_semantics=("parallel", "parallel", "parallel"),
            vmem_limit_bytes=vmem_limit,
        ),
        cost_estimate=cost,
    )(*args)


# ----------------------------------------------------------------------------
# Module (parameter setup + layout glue in plain JAX, matmul/skew in Pallas)
# ----------------------------------------------------------------------------
class LearnedRelativePositionalEmbedding:
    def __init__(self, max_relative_pos, num_heads, embedding_dim,
                 unmasked=False, heads_share_embeddings=False,
                 add_to_values=False, logits_dtype=jnp.float32, key=None):
        self.max_relative_pos = max_relative_pos
        self.num_heads = num_heads
        self.embedding_dim = embedding_dim
        self.unmasked = unmasked
        self.heads_share_embeddings = heads_share_embeddings
        self.add_to_values = add_to_values
        self.logits_dtype = jnp.dtype(logits_dtype)
        self._max_row_tile = None   # test hook: cap the L tile
        num_embeddings = 2 * max_relative_pos - 1 if unmasked else max_relative_pos
        if heads_share_embeddings:
            embedding_size = [num_embeddings, embedding_dim, 1]
        else:
            embedding_size = [num_heads, num_embeddings, embedding_dim, 1]
        if add_to_values:
            embedding_size[-1] = 2
        initial_stddev = embedding_dim ** (-0.5)
        key = jax.random.PRNGKey(0) if key is None else key
        self.embeddings = (
            jax.random.normal(key, tuple(embedding_size), dtype=jnp.float32)
            * initial_stddev
        )

    # ------------------------------------------------------------------ glue
    def get_embeddings_for_query(self, length):
        pad_length = max(length - self.max_relative_pos, 0)
        start_pos = max(self.max_relative_pos - length, 0)
        emb = self.embeddings
        rel_axis = emb.ndim - 3
        pad_cfg = [(0, 0)] * emb.ndim
        if self.unmasked:
            pad_cfg[rel_axis] = (pad_length, pad_length)
            padded = jnp.pad(emb, pad_cfg)
            used = lax.slice_in_dim(padded, start_pos, start_pos + 2 * length - 1,
                                    axis=rel_axis)
        else:
            pad_cfg[rel_axis] = (pad_length, 0)
            padded = jnp.pad(emb, pad_cfg)
            used = lax.slice_in_dim(padded, start_pos, start_pos + length,
                                    axis=rel_axis)
        return used

    # --------------------------------------------------------------- forward
    def __call__(self, query, saved_state=None):
        # query: (length, batch*num_heads, embed_dim)
        if saved_state is not None:
            # TODO(synk): incremental decoder_step path (saved_state) not implemented.
            raise NotImplementedError("saved_state / decoder_step path not implemented")
        L, BH, D = query.shape
        used = self.get_embeddings_for_query(L)
        values_embeddings = used[..., 1] if self.add_to_values else None
        key_emb = used[..., 0]                         # (M, D) or (H, M, D)
        if self.heads_share_embeddings:
            key_emb = key_emb[None]                    # (1, M, D)
        He, M, _ = key_emb.shape
        assert BH % He == 0
        pad_length = max(L - self.max_relative_pos, 0)

        fuse_skew = self.unmasked and _fused_roll_supported()

        if self.unmasked:
            m_eff = M                                  # 2L - 1
        else:
            # Prepend an all-zero relative row: the kernel output then already
            # carries the leading zero column that rel->abs indexing needs.
            key_emb = jnp.pad(key_emb, ((0, 0), (1, 0), (0, 0)))
            m_eff = M + 1                              # L + 1

        d_pad = _round_up(D, 128)
        m_pad = _round_up(m_eff, 128)
        out_dtype = self.logits_dtype
        out_itemsize = jnp.dtype(out_dtype).itemsize
        out_width = _round_up(L, 128) if fuse_skew else m_pad

        budget, vmem_limit = _vmem_budget()
        row_tile, l_pad = _choose_row_tile(
            L, d_pad, m_pad, out_width, out_itemsize,
            has_bias=pad_length > 0, budget=budget, vmem_limit=vmem_limit,
            max_row_tile=self._max_row_tile)

        # Column-only -1e8 bias for out-of-range relative positions (skipped when
        # L <= max_relative_pos).
        bias = None
        if pad_length > 0:
            col = jnp.arange(m_pad)
            if self.unmasked:
                oob = (col < pad_length) | ((col >= M - pad_length) & (col < M))
            else:
                oob = (col >= 1) & (col < 1 + pad_length)   # shifted by the zero column
            bias = jnp.where(oob, jnp.float32(-1e8), jnp.float32(0.0))[None, :]

        # Q: (L, BH, D) -> (BH, Lp, Dp) bf16 (f32 accumulation in-kernel).
        q = jnp.transpose(query, (1, 0, 2)).astype(jnp.bfloat16)
        q = jnp.pad(q, ((0, 0), (0, l_pad - L), (0, d_pad - D)))
        # E: (He, m_eff, D) -> pre-transposed (He, Dp, Mp) bf16 (plain K-major matmul).
        e = jnp.transpose(key_emb, (0, 2, 1)).astype(jnp.bfloat16)
        e = jnp.pad(e, ((0, 0), (0, d_pad - D), (0, m_pad - m_eff)))

        cost = pl.CostEstimate(
            flops=2 * BH * l_pad * m_pad * d_pad,
            transcendentals=0,
            bytes_accessed=(q.size * 2 + e.size * 2
                            + (int(bias.size) * 4 if bias is not None else 0)
                            + BH * l_pad * out_width * out_itemsize))

        roll_params = (L, m_pad, out_width, row_tile) if fuse_skew else None
        out = _positional_logits_pallas(
            q, e, bias, out_width=out_width, out_dtype=out_dtype,
            row_tile=row_tile, roll_params=roll_params, vmem_limit=vmem_limit,
            cost=cost)                                   # (BH, Lp, out_width)

        # Relative -> absolute indexing.
        if fuse_skew:
            logits = out[:, :L, :L]                      # no-op when L is aligned
        elif self.unmasked:
            x = out[:, :L, :2 * L]                       # trailing zero column is free
            x = x.reshape(BH, 2 * L * L)[:, :L * (2 * L - 1)]
            logits = x.reshape(BH, L, 2 * L - 1)[:, :, L - 1:]
        else:
            x = out[:, :L, :L + 1]                       # leading zero column is free
            logits = x.reshape(BH, L * (L + 1)).reshape(BH, L + 1, L)[:, 1:, :]
        return logits, values_embeddings

    # ------------------------------------------------ pure-JAX reference path
    def _rel_to_abs_seq_major(self, x):
        length, bsz_heads, _ = x.shape
        if self.unmasked:
            x = jnp.pad(x, ((0, 0), (0, 0), (0, 1)))
            x = jnp.transpose(x, (1, 0, 2)).reshape(bsz_heads, length * 2 * length)
            x = jnp.pad(x, ((0, 0), (0, length - 1)))
            x = x.reshape(bsz_heads, length + 1, 2 * length - 1)
            return x[:, :length, length - 1:]
        else:
            x = jnp.pad(x, ((0, 0), (0, 0), (1, 0)))
            x = jnp.transpose(x, (1, 0, 2)).reshape(bsz_heads, length + 1, length)
            return x[:, 1:, :]

    def reference(self, query):
        L, BH, D = query.shape
        used = self.get_embeddings_for_query(L)
        values_embeddings = used[..., 1] if self.add_to_values else None
        key_emb = used[..., 0]
        if self.heads_share_embeddings:
            logits = jnp.einsum('lbd,md->lbm', query, key_emb)
        else:
            qq = query.reshape(L, -1, self.num_heads, D)
            logits = jnp.einsum('lbhd,hmd->lbhm', qq, key_emb)
            logits = logits.reshape(L, -1, logits.shape[-1])
        if L > self.max_relative_pos:
            p = L - self.max_relative_pos
            logits = logits.at[:, :, :p].add(-1e8)
            if self.unmasked:
                logits = logits.at[:, :, -p:].add(-1e8)
        return self._rel_to_abs_seq_major(logits), values_embeddings


# ----------------------------------------------------------------------------
if __name__ == "__main__":
    root = jax.random.PRNGKey(0)
    keys = jax.random.split(root, 10)

    RTOL, ATOL = 2e-2, 2e-2   # bf16 MXU inputs (f32 accumulation) vs f32 reference

    # Config 1: unmasked (encoder), per-head embeddings, add_to_values, L > max_rel.
    L, B, H, D, max_rel = 8, 2, 4, 32, 6
    mod1 = LearnedRelativePositionalEmbedding(
        max_relative_pos=max_rel, num_heads=H, embedding_dim=D,
        unmasked=True, heads_share_embeddings=False, add_to_values=True, key=keys[0])
    query1 = jax.random.normal(keys[1], (L, B * H, D), dtype=jnp.float32)
    out1, vals1 = mod1(query1)
    ref1, _ = mod1.reference(query1)
    out1 = jax.block_until_ready(out1)
    assert out1.shape == (B * H, L, L), out1.shape
    assert vals1.shape == (H, 2 * L - 1, D), vals1.shape
    assert jnp.allclose(out1, ref1, rtol=RTOL, atol=ATOL), "mismatch (config 1)"

    # Config 2: masked (decoder), shared embeddings, no value embeddings.
    mod2 = LearnedRelativePositionalEmbedding(
        max_relative_pos=max_rel, num_heads=H, embedding_dim=D,
        unmasked=False, heads_share_embeddings=True, add_to_values=False, key=keys[2])
    query2 = jax.random.normal(keys[3], (L, B * H, D), dtype=jnp.float32)
    out2, vals2 = mod2(query2)
    ref2, _ = mod2.reference(query2)
    out2 = jax.block_until_ready(out2)
    assert out2.shape == (B * H, L, L), out2.shape
    assert vals2 is None
    assert jnp.allclose(out2, ref2, rtol=RTOL, atol=ATOL), "mismatch (config 2)"

    # Config 3: masked, per-head embeddings, L < max_relative_pos (no -1e8 / bias path).
    mod3 = LearnedRelativePositionalEmbedding(
        max_relative_pos=16, num_heads=H, embedding_dim=D,
        unmasked=False, heads_share_embeddings=False, add_to_values=False, key=keys[4])
    query3 = jax.random.normal(keys[5], (L, B * H, D), dtype=jnp.float32)
    out3, vals3 = mod3(query3)
    ref3, _ = mod3.reference(query3)
    out3 = jax.block_until_ready(out3)
    assert out3.shape == (B * H, L, L), out3.shape
    assert vals3 is None
    assert jnp.allclose(out3, ref3, rtol=RTOL, atol=ATOL), "mismatch (config 3)"

    # Config 4: unmasked, shared embeddings, multi L-tile (exercises the fused skew with
    # several row-tile bases / wraparound), bf16 logits output.
    L4 = 40
    mod4 = LearnedRelativePositionalEmbedding(
        max_relative_pos=64, num_heads=H, embedding_dim=D,
        unmasked=True, heads_share_embeddings=True, add_to_values=False,
        logits_dtype=jnp.bfloat16, key=keys[6])
    mod4._max_row_tile = 16   # force 3 L-tiles at this toy size
    query4 = jax.random.normal(keys[7], (L4, B * H, D), dtype=jnp.float32)
    out4, vals4 = mod4(query4)
    ref4, _ = mod4.reference(query4)
    out4 = jax.block_until_ready(out4)
    assert out4.shape == (B * H, L4, L4), out4.shape
    assert out4.dtype == jnp.bfloat16
    assert vals4 is None
    assert jnp.allclose(out4.astype(jnp.float32), ref4, rtol=5e-2, atol=5e-2), \
        "mismatch (config 4)"

    print("KERNEL_OK")
</pallas_src>

<mosaic_0001>
module attributes {stable_mosaic.version = 11 : i64} {
  func.func @kern(%arg0: i32, %arg1: memref<1x16x128xf32, #tpu.memory_space<vmem>>, %arg2: memref<1x16x128xf32, #tpu.memory_space<vmem>>) attributes {dimension_semantics = [#tpu.dimension_semantics<arbitrary>], iteration_bounds = array<i64: 18>, scalar_prefetch = 0 : i64, scratch_operands = 0 : i64, tpu.core_type = #tpu.core_type<tc>, window_params = [{transform_indices = @transform_0, window_bounds = array<i64: 1, 16, 128>}, {transform_indices = @transform_1, window_bounds = array<i64: 1, 16, 128>}]} {
    %c16_i32 = arith.constant 16 : i32
    %0 = arith.muli %arg0, %c16_i32 : i32
    %c65_i32 = arith.constant 65 : i32
    %1 = arith.addi %0, %c65_i32 : i32
    %c0 = arith.constant 0 : index
    %c0_0 = arith.constant 0 : index
    %c0_1 = arith.constant 0 : index
    %2 = vector.load %arg1[%c0, %c0_0, %c0_1] : memref<1x16x128xf32, #tpu.memory_space<vmem>>, vector<1x16x128xf32>
    %3 = vector.shape_cast %2 : vector<1x16x128xf32> to vector<16x128xf32>
    %4 = tpu.dynamic_rotate %3 by %1 dim 1 {stride = 1 : si32, stride_dimension = 0 : si32} : vector<16x128xf32>, i32 -> vector<16x128xf32>
    %c0_2 = arith.constant 0 : index
    %c0_3 = arith.constant 0 : index
    %c0_4 = arith.constant 0 : index
    %5 = vector.load %arg2[%c0_2, %c0_3, %c0_4] : memref<1x16x128xf32, #tpu.memory_space<vmem>>, vector<1x16x128xf32>
    %6 = vector.shape_cast %5 : vector<1x16x128xf32> to vector<16x128xf32>
    %7 = vector.shape_cast %4 : vector<16x128xf32> to vector<1x16x128xf32>
    tpu.vector_store %arg2[%c0_2, %c0_3, %c0_4], %7 {strides = array<i32>} : memref<1x16x128xf32, #tpu.memory_space<vmem>>, vector<1x16x128xf32>,
    return
  }
  func.func @transform_0(%arg0: i32) -> (i32, i32, i32) {
    %c0_i32 = arith.constant 0 : i32
    %c0_i32_0 = arith.constant 0 : i32
    %c0_i32_1 = arith.constant 0 : i32
    return %arg0, %c0_i32, %c0_i32_0 : i32, i32, i32
  }
  func.func @transform_1(%arg0: i32) -> (i32, i32, i32) {
    %c0_i32 = arith.constant 0 : i32
    %c0_i32_0 = arith.constant 0 : i32
    %c0_i32_1 = arith.constant 0 : i32
    return %arg0, %c0_i32, %c0_i32_0 : i32, i32, i32
  }
}

module attributes {stable_mosaic.version = 11 : i64} {
  func.func @kernel(%arg0: i32, %arg1: i32, %arg2: i32, %arg3: memref<1x16x128xbf16, #tpu.memory_space<vmem>>, %arg4: memref<1x128x128xbf16, #tpu.memory_space<vmem>>, %arg5: memref<1x128xf32, #tpu.memory_space<vmem>>, %arg6: memref<1x16x128xf32, #tpu.memory_space<vmem>>) attributes {dimension_semantics = [#tpu.dimension_semantics<parallel>, #tpu.dimension_semantics<parallel>, #tpu.dimension_semantics<parallel>], iteration_bounds = array<i64: 4, 2, 1>, scalar_prefetch = 0 : i64, scratch_operands = 0 : i64, tpu.core_type = #tpu.core_type<tc>, window_params = [{transform_indices = @transform_0, window_bounds = array<i64: 1, 16, 128>}, {transform_indices = @transform_1, window_bounds = array<i64: 1, 128, 128>}, {pipeline_mode = #tpu.pipeline_mode<synchronous>, transform_indices = @transform_2, window_bounds = array<i64: 1, 128>}, {transform_indices = @transform_3, window_bounds = array<i64: 1, 16, 128>}]} {
    %c0 = arith.constant 0 : index
    %c0_0 = arith.constant 0 : index
    %c0_1 = arith.constant 0 : index
    %0 = vector.load %arg3[%c0, %c0_0, %c0_1] : memref<1x16x128xbf16, #tpu.memory_space<vmem>>, vector<1x16x128xbf16>
    %1 = vector.shape_cast %0 : vector<1x16x128xbf16> to vector<16x128xbf16>
    %c0_2 = arith.constant 0 : index
    %c0_3 = arith.constant 0 : index
    %c0_4 = arith.constant 0 : index
    %2 = vector.load %arg4[%c0_2, %c0_3, %c0_4] : memref<1x128x128xbf16, #tpu.memory_space<vmem>>, vector<1x128x128xbf16>
    %3 = vector.shape_cast %2 : vector<1x128x128xbf16> to vector<128x128xbf16>
    %cst = arith.constant dense<0.000000e+00> : vector<16x128xf32>
    %4 = tpu.matmul %1, %3, %cst {dimension_numbers = #tpu.dot_dimension_numbers<[1], [0], [0], [1], [0, 0, 1, 1], [], []>} : vector<16x128xbf16>, vector<128x128xbf16>, vector<16x128xf32> -> vector<16x128xf32>
    %c0_5 = arith.constant 0 : index
    %c0_6 = arith.constant 0 : index
    %5 = vector.load %arg5[%c0_5, %c0_6] : memref<1x128xf32, #tpu.memory_space<vmem>>, vector<1x128xf32>
    %6 = vector.broadcast %5 : vector<1x128xf32> to vector<16x128xf32>
    %7 = arith.addf %4, %6 : vector<16x128xf32>
    %c0_7 = arith.constant 0 : index
    %c0_8 = arith.constant 0 : index
    %c0_9 = arith.constant 0 : index
    %8 = vector.load %arg6[%c0_7, %c0_8, %c0_9] : memref<1x16x128xf32, #tpu.memory_space<vmem>>, vector<1x16x128xf32>
    %9 = vector.shape_cast %8 : vector<1x16x128xf32> to vector<16x128xf32>
    %10 = vector.shape_cast %7 : vector<16x128xf32> to vector<1x16x128xf32>
    tpu.vector_store %arg6[%c0_7, %c0_8, %c0_9], %10 {strides = array<i32>} : memref<1x16x128xf32, #tpu.memory_space<vmem>>, vector<1x16x128xf32>,
    return
  }
  func.func @transform_0(%arg0: i32, %arg1: i32, %arg2: i32) -> (i32, i32, i32) {
    %c4_i32 = arith.constant 4 : i32
    %0 = arith.muli %arg1, %c4_i32 : i32
    %1 = arith.addi %0, %arg0 : i32
    %c0_i32 = arith.constant 0 : i32
    %c0_i32_0 = arith.constant 0 : i32
    return %1, %arg2, %c0_i32 : i32, i32, i32
  }
  func.func @transform_1(%arg0: i32, %arg1: i32, %arg2: i32) -> (i32, i32, i32) {
    %c0_i32 = arith.constant 0 : i32
    %c0_i32_0 = arith.constant 0 : i32
    %c0_i32_1 = arith.constant 0 : i32
    return %arg0, %c0_i32, %c0_i32_0 : i32, i32, i32
  }
  func.func @transform_2(%arg0: i32, %arg1: i32, %arg2: i32) -> (i32, i32) {
    %c0_i32 = arith.constant 0 : i32
    %c0_i32_0 = arith.constant 0 : i32
    %c0_i32_1 = arith.constant 0 : i32
    return %c0_i32, %c0_i32_0 : i32, i32
  }
  func.func @transform_3(%arg0: i32, %arg1: i32, %arg2: i32) -> (i32, i32, i32) {
    %c4_i32 = arith.constant 4 : i32
    %0 = arith.muli %arg1, %c4_i32 : i32
    %1 = arith.addi %0, %arg0 : i32
    %c0_i32 = arith.constant 0 : i32
    %c0_i32_0 = arith.constant 0 : i32
    return %1, %arg2, %c0_i32 : i32, i32, i32
  }
}

</mosaic_0001>

<bundles_post_ra>
// kernel: tpu_custom_call.1
= control target key start
LH: loop header
LB: loop body
LE: loop exit
PB: predicated region body
PF: predicated region fallthrough
CT: control target
= control target key end

     0   :  { %6 = vsyncpa [#allocation3], 0  ;;  %s574_s0 = inlined_call_operand.hbm [shape: f32[18,16,128], index: 0, kind: input, shape index: {}]   ;;  %s575_s1 = inlined_call_operand.hbm [shape: f32[18,16,128], index: 1, kind: output, shape index: {}]  }
   0x1   :  { %8 = vsyncpa [#allocation3 + $0x1], 0 }
   0x2   :  { %9 = vsyncpa [#allocation4], 0 }
   0x3   :  { %11 = vsyncpa [#allocation4 + $0x1], 0  ;;  %s421_s6 = smov 0   ;;  %s423_s7 = smov 0  }
   0x4   :  { %s425_s8 = smov 0   ;;  %s427_s9 = smov 0  }
   0x5 LB: > { %s442_s10 = sadd.s32 4294967295, %s403_s9   ;;  %s244_s11 = sadd.s32 4294967294, %s403_s9   ;;  %s403_s9 = sphi %s427_s9, %s589_s9   ;;  %s399_s8 = sphi %s425_s8, %s588_s8   ;;  %s395_s7 = sphi %s423_s7, %s587_s7   ;;  %s391_s6 = sphi %s421_s6, %s586_s6  }
   0x6   : > { %s446_s12 = sadd.s32 1, %s403_s9   ;;  %s24_s13 = sadd.s32 1, %s399_s8 }
   0x7   : > { %s21_s14 = ssub.s32 %s403_s9, %s446_s12  ;;  %p31_p0 = scmp.ne.s32.totalorder %s399_s8, %s395_s7 }
   0x8   : > { %p22_p1 = scmp.eq.s32.totalorder %s21_s14, 0  ;;  %p32_p2 = scmp.eq.s32.totalorder %s403_s9, 0 }
   0x9   : > { %p37_p3 = scmp.ne.s32.totalorder %s395_s7, %s391_s6  ;;  %p38_p4 = scmp.eq.s32.totalorder %s442_s10, 0 }
   0xa   : > { %s458_s15 = scalar_select %p22_p1, %s399_s8, %s24_s13  }
   0xb   : > { %p460_p5 = por %p32_p2, %p31_p0  ;;  %p464_p6 = por %p38_p4, %p37_p3 }
   0xc   : > { %p61_p7 = scmp.eq.s32.totalorder %s442_s10, 17  ;;  %p67_p8 = scmp.eq.s32.totalorder %s244_s11, 17 }
   0xd   : > { %s579_s17 = scalar_select %p464_p6, 1, 0 }
   0xe   : > { %p273_p9 = scmp.lt.s32.totalorder %s403_s9, 18  ;;  %p470_p10 = por %p61_p7, %p31_p0 }
   0xf   : > { %p474_p11 = por %p67_p8, %p37_p3  ;;  %s87_s20 = sand.u32 1, %s399_s8  }
  0x10   : > { %s580_s18 = scalar_select %p470_p10, 1, 0 }
  0x11   : > { %s581_s19 = scalar_select %p474_p11, 1, 0 }
  0x12   : > { %s259_s21 = sshll.u32 %s403_s9, 8  ;;  %s247_s22 = sshll.u32 %s87_s20, 4 }
  0x13   : > { %s483_s25 = scalar_lea.hbm %s574_s0, %s259_s21  ;;  %s91_s26 = scalar_lea.vmem [#allocation2], %s247_s22 }
  0x14   : > { %s98_s27 = sshll.u32 %s91_s26, 4  ;;  %p487_p12 = pnand %p273_p9, %p460_p5  ;;  %s491_s27 = int_to_ptr.vmem [resolvable:$true] %s98_s27 }
  0x15   : > { %s493_s29 = scalar_lea.sflag [#allocation3], %s87_s20  ;;  %s311_s30 = scalar_lea.hbm %s483_s25, 256 }
  0x16   : > { %p312_p13 = scmp.ne.s32.totalorder %s483_s25, %s311_s30  ;;  %p313_p0 = pneg %p487_p12 }
  0x17   : > { %s316_s4 = scalar_lea.hbm %s574_s0, 4608  ;;  %p317_p3 = scmp.lt.s32.totalorder %s483_s25, %s574_s0 }
  0x18   : > { %p314_p1 = pnand %p313_p0, %p312_p13  ;;  %p318_p4 = scmp.lt.s32.totalorder %s316_s4, %s311_s30 }
  0x1a   : > { %p315_p2 = pneg %p314_p1  ;;  %p319_p5 = por %p318_p4, %p317_p3 }
  0x1c   : > { %p320_p7 = pnand %p319_p5, %p315_p2 }
  0x1e   : > { %323 = shalt.err (!%p320_p7)
}
  0x1f   : > { %s324_s13 = scalar_lea.vmem %s491_s27, 256  ;;  %s405_s14 = smov [#allocation2]  }
  0x20   : > { %p325_p8 = scmp.ne.s32.totalorder %s491_s27, %s324_s13  ;;  %s329_s16 = sshll.u32 %s405_s14, 4  ;;  %s330_s16 = int_to_ptr.vmem [resolvable:$false] %s329_s16 }
  0x21   : > { %s331_s20 = scalar_lea.vmem %s330_s16, 512  ;;  %p332_p1 = scmp.lt.s32.totalorder %s491_s27, %s330_s16 }
  0x22   : > { %p327_p9 = pnand %p325_p8, %p313_p0  ;;  %p333_p11 = scmp.lt.s32.totalorder %s331_s20, %s324_s13 }
  0x24   : > { %p328_p13 = pneg %p327_p9  ;;  %p334_p10 = por %p333_p11, %p332_p1 }
  0x26   : > { %p335_p6 = pnand %p334_p10, %p328_p13 }
  0x28   : > { %338 = shalt.err (!%p335_p6)
}
  0x29   : > { %s406_s21 = smov 128   ;;  %s407_s22 = smov 8  }
  0x2a   : > { %268 = dma.hbm_to_vmem [thread:$0]  (!%p487_p12), %s483_s25, 256, %s491_s27, %s493_s29, %s406_s21, %s406_s21, %s407_s22  }
  0x2b   : > { %p250_p0 = scmp.ge.s32.totalorder %s403_s9, 1  ;;  %p106_p2 = scmp.lt.s32.totalorder %s403_s9, 19 }
  0x2d   : > { %p107_p3 = pnand %p250_p0, %p106_p2 }
  0x2e   : > { %s517_s23 = sand.u32 (!%p107_p3), 1, %s395_s7   ;;  %p583_p6 = scmp.ne.s32.totalorder (!%p107_p3), %s579_s17, 0 }
  0x2f   : > { %110 = sbr.rel (%p107_p3) target bundleno = 191 (0xbf), region = 24  ;;  %s251_s24 = sshll.u32 (!%p107_p3), %s517_s23, 4 }
  0x30   : > { %s113_s26 = scalar_lea.sflag (!%p107_p3), [#allocation3], %s517_s23  ;;  %s116_s30 = scalar_lea.vmem (!%p107_p3), [#allocation2], %s251_s24 }
  0x34   : > { %382 = dma.done.wait (%p583_p6), %s113_s26, 256  }
  0x35   : > { %384 = vsyncadd (%p583_p6), %s113_s26, 4294967040  ;;  %s253_s25 = sshll.u32 %s442_s10, 4  ;;  %v137_v0 = vld [vmem:[%s116_s30] sm:$0xff]  ;;  %v138_v1 = vld [vmem:[%s116_s30 + $0x8] sm:$0xff]  ;;  %s134_s13 = scalar_lea.vmem [#allocation5], %s251_s24 }
  0x36   : > { %s136_s27 = sadd.s32 65, %s253_s25  ;;  %s171_s17 = sshll.u32 %s134_s13, 4  ;;  %s527_s17 = int_to_ptr.vmem [resolvable:$true] %s171_s17 }
  0x37   : > { %s139_s28 = sand.u32 127, %s136_s27   ;;  %s260_s14 = sshll.u32 %s442_s10, 8 }
  0x38   : > { %s142_s29 = sand.u32 255, %s139_s28  ;;  %s147_s2 = sadd.s32 8, %s139_s28 }
  0x39   : > { %s148_s3 = sand.u32 127, %s147_s2   ;;  %s144_s4 = sor.u32 256, %s142_s29 }
  0x3a   : > { %s150_s5 = sand.u32 255, %s148_s3  ;;  %145 = vrot.lane.b32.xlu0 %v137_v0, %s144_s4  ;;  %s532_s21 = scalar_lea.hbm %s575_s1, %s260_s14 }
  0x3b   : > { %s152_s11 = sor.u32 256, %s150_s5  ;;  %s158_s22 = scalar_lea.sflag [#allocation4], %s517_s23 }
  0x3c   : > { %s339_s26 = scalar_lea.vmem %s527_s17, 256  ;;  %p584_p11 = scmp.ne.s32.totalorder %s580_s18, 0 }
  0x3d   : > { %p340_p10 = scmp.ne.s32.totalorder %s527_s17, %s339_s26  ;;  %s408_s10 = smov [#allocation5]  }
  0x3e   : > { %153 = vrot.lane.b32.xlu0 %v138_v1, %s152_s11  ;;  %s343_s24 = sshll.u32 %s408_s10, 4  ;;  %s344_s24 = int_to_ptr.vmem [resolvable:$false] %s343_s24 }
  0x3f   : > { %p341_p12 = pnand %p340_p10, %p584_p11  ;;  %s345_s30 = scalar_lea.vmem %s344_s24, 512 }
  0x40   : > { %p346_p5 = scmp.lt.s32.totalorder %s527_s17, %s344_s24  ;;  %p347_p7 = scmp.lt.s32.totalorder %s345_s30, %s339_s26 }
  0x41   : > { %p342_p4 = pneg %p341_p12 }
  0x42   : > { %p348_p8 = por %p347_p7, %p346_p5 }
  0x44   : > { %p349_p9 = pnand %p348_p8, %p342_p4 }
  0xac   : > { %v146_v2 = vpop.permute.xlu0 %145 }
  0xad   : > { %155 = vst [vmem:[%s134_s13] sm:$0xff] %v146_v2 }
  0xb0   : > { %v154_v3 = vpop.permute.xlu0 %153 }
  0xb1   : > { %156 = vst [vmem:[%s134_s13 + $0x8] sm:$0xff] %v154_v3 }
  0xb2   : > { %352 = shalt.err (!%p349_p9)
}
  0xb3   : > { %s353_s25 = scalar_lea.hbm %s532_s21, 256  ;;  %s357_s29 = scalar_lea.hbm %s575_s1, 4608 }
  0xb4   : > { %p354_p13 = scmp.ne.s32.totalorder %s532_s21, %s353_s25  ;;  %p358_p2 = scmp.lt.s32.totalorder %s532_s21, %s575_s1 }
  0xb5   : > { %p359_p3 = scmp.lt.s32.totalorder %s357_s29, %s353_s25 }
  0xb6   : > { %p355_p1 = pnand %p354_p13, %p584_p11 }
  0xb7   : > { %p360_p6 = por %p359_p3, %p358_p2 }
  0xb8   : > { %p356_p0 = pneg %p355_p1 }
  0xba   : > { %p361_p10 = pnand %p360_p6, %p356_p0 }
  0xbc   : > { %364 = shalt.err (!%p361_p10)
}
  0xbd   : > { %s409_s4 = smov 128   ;;  %s410_s5 = smov 8  }
  0xbe   : > { %263 = dma.vmem_to_hbm [thread:$0]  (%p584_p11), %s527_s17, 256, %s532_s21, %s158_s22, %s409_s4, %s409_s4, %s410_s5  }
  0xbf PF: > { %p274_p12 = scmp.ge.s32.totalorder %s403_s9, 2  ;;  %s186_s11 = sand.u32 1, %s391_s6  }
  0xc0   : > { %p585_p4 = scmp.ne.s32.totalorder %s581_s19, 0  ;;  %s187_s13 = scalar_lea.sflag [#allocation4], %s186_s11 }
  0xc2   : > { %p270_p5 = pnand %p274_p12, %p585_p4 }
  0xc4   : > { %p271_p7 = pneg %p270_p5 }
  0xc6   : > { %386 = dma.done.wait (%p271_p7), %s187_s13, 256  }
  0xc7   : > { %388 = vsyncadd (%p271_p7), %s187_s13, 4294967040  ;;  %p14_p8 = scmp.ge.s32.totalorder %s446_s12, 20   ;;  %s586_s6 = smov %s395_s7 }
  0xc8   : > { %s587_s7 = smov %s399_s8  ;;  %s588_s8 = smov %s458_s15 }
  0xc9   : > { %s589_s9 = smov %s446_s12  ;;  %16 = sbr.rel (!%p14_p8) target bundleno = 5 (0x5), region = 69 }
  0xce   :  { %192 = vsyncpa [#allocation3], 1 }
  0xcf   :  { %194 = vsyncpa [#allocation3 + $0x1], 1 }
  0xd0   :  { %195 = vsyncpa [#allocation4], 1 }
  0xd1   :  { %197 = vsyncpa [#allocation4 + $0x1], 1 }

// kernel: tpu_custom_call.1
= control target key start
LH: loop header
LB: loop body
LE: loop exit
PB: predicated region body
PF: predicated region fallthrough
CT: control target
= control target key end

     0   :  { %8 = vsyncpa [#allocation3], 0  ;;  %s1206_s0 = inlined_call_operand.hbm [shape: bf16[8,16,128], index: 0, kind: input, shape index: {}]   ;;  %s1207_s1 = inlined_call_operand.hbm [shape: bf16[4,128,128], index: 1, kind: input, shape index: {}]   ;;  %s1208_s2 = inlined_call_operand.vmem [shape: f32[1,128], index: 2, kind: input, shape index: {}]   ;;  %s1209_s3 = inlined_call_operand.hbm [shape: f32[8,16,128], index: 3, kind: output, shape index: {}]  }
   0x1   :  { %10 = vsyncpa [#allocation3 + $0x1], 0 }
   0x2   :  { %11 = vsyncpa [#allocation6], 0 }
   0x3   :  { %13 = vsyncpa [#allocation6 + $0x1], 0 }
   0x4   :  { %14 = vsyncpa [#allocation4], 0 }
   0x5   :  { %16 = vsyncpa [#allocation4 + $0x1], 0  ;;  %s931_s12 = smov 0   ;;  %s933_s13 = smov 0  }
   0x6   :  { %s935_s14 = smov 0   ;;  %s937_s15 = smov 0  }
   0x7   :  { %s939_s16 = smov 0   ;;  %s941_s17 = smov 0  }
   0x8   :  { %s943_s18 = smov 0   ;;  %s945_s19 = smov 0  }
   0x9   :  { %s947_s20 = smov 0   ;;  %s949_s21 = smov 0  }
   0xa   :  { %s951_s22 = smov 0  }
   0xb LB: > { %1218 = sst [smem:[#allocation11_spill]] %s880_s17  ;;  %s531_s23 = sadd.s32 4294967295, %s900_s22   ;;  %s900_s22 = sphi %s951_s22, %s22_s22   ;;  %s896_s21 = sphi %s949_s21, %s1249_s21   ;;  %s892_s20 = sphi %s947_s20, %s1241_s20   ;;  %s888_s19 = sphi %s945_s19, %s1248_s19   ;;  %s884_s18 = sphi %s943_s18, %s1240_s18   ;;  %s880_s17 = sphi %s941_s17, %s1239_s17   ;;  %s876_s16 = sphi %s939_s16, %s1247_s16   ;;  %s872_s15 = sphi %s937_s15, %s1246_s15   ;;  %s868_s14 = sphi %s935_s14, %s1245_s14   ;;  %s864_s13 = sphi %s933_s13, %s1244_s13   ;;  %s860_s12 = sphi %s931_s12, %s1243_s12  }
   0xc   : > { %1219 = sst [smem:[#allocation12_spill]] %s892_s20  ;;  %s532_s24 = sadd.s32 4294967294, %s900_s22  }
   0xd   : > { %s37_s25 = sadd.s32 1, %s892_s20  ;;  %s41_s26 = sadd.s32 1, %s896_s21 }
   0xe   : > { %p39_p0 = scmp.ge.s32.totalorder %s37_s25, 2  ;;  %s533_s27 = sshll.u32 %s892_s20, 2 }
   0xf   : > { %s46_s28 = sadd.s32 %s896_s21, %s533_s27  ;;  %s54_s29 = sadd.s32 1, %s880_s17 }
  0x10   : > { %s1251_s25 = smov (%p39_p0, %s37_s25), 0  ;;  %s1253_s26 = smov (!%p39_p0, %s41_s26), %s896_s21 }
  0x11   : > { %1220 = sst [smem:[#allocation13_spill]] %s1251_s25  ;;  %s534_s30 = sshll.u32 %s1251_s25, 2 }
  0x12   : > { %p61_p1 = scmp.ne.s32.totalorder %s880_s17, %s876_s16  ;;  %p43_p2 = scmp.ge.s32.totalorder %s1253_s26, 4 }
  0x13   : > { %p1214_p3 = scmp.eq.s32.totalorder %s900_s22, 0  ;;  %p67_p4 = scmp.ne.s32.totalorder %s876_s16, %s872_s15 }
  0x14   : > { %p1002_p5 = scmp.eq.s32.totalorder %s531_s23, 0  ;;  %s1255_s26 = smov (%p43_p2, %s1253_s26), 0 }
  0x15   : > { %1222 = sst [smem:[#allocation14_spill]] %s1255_s26  ;;  %p1013_p6 = por %p1214_p3, %p61_p1 }
  0x16   : > { %p1022_p7 = por %p1002_p5, %p67_p4  ;;  %s48_s7 = sadd.s32 %s534_s30, %s1255_s26 }
  0x17   : > { %s77_s8 = ssub.s32 %s896_s21, %s1255_s26  ;;  %s49_s9 = ssub.s32 %s46_s28, %s48_s7 }
  0x18   : > { %p1029_p8 = scmp.eq.s32.totalorder %s77_s8, 0  ;;  %p52_p9 = scmp.eq.s32.totalorder %s49_s9, 0 }
  0x19   : > { %p144_p10 = scmp.eq.s32.totalorder %s531_s23, 7  ;;  %p150_p11 = scmp.eq.s32.totalorder %s532_s24, 7 }
  0x1a   : > { %s1034_s11 = scalar_select %p52_p9, %s880_s17, %s54_s29  }
  0x1b   : > { %p1039_p12 = por %p144_p10, %p61_p1  ;;  %p1046_p13 = por %p150_p11, %p67_p4 }
  0x1c   : > { %1226 = sst [smem:[#allocation15_spill]] %s1034_s11  ;;  %p615_p0 = scmp.lt.s32.totalorder %s900_s22, 8 }
  0x1d   : > { %s1227_s27 = scalar_select %p1039_p12, 1, 0 }
  0x1e   : > { %s1228_s30 = scalar_select %p1046_p13, 1, 0 }
  0x1f   : > { %s173_s7 = sand.u32 1, %s880_s17   ;;  %s566_s26 = sshll.u32 %s46_s28, 7 }
  0x20   : > { %s539_s8 = sshll.u32 %s173_s7, 3  ;;  %s187_s23 = scalar_lea.hbm %s1206_s0, %s566_s26 }
  0x21   : > { %s177_s24 = scalar_lea.vmem [#allocation2], %s539_s8  ;;  %p1059_p1 = pnand %p615_p0, %p1013_p6 }
  0x22   : > { %s188_s29 = sshll.u32 %s177_s24, 4  ;;  %p546_p2 = scmp.ge.s32.totalorder %s900_s22, 1  ;;  %s189_s29 = int_to_ptr.vmem [resolvable:$true] %s188_s29 }
  0x23   : > { %s174_s11 = scalar_lea.sflag [#allocation3], %s173_s7  ;;  %p722_p4 = pneg %p1059_p1 }
  0x24   : > { %s733_s17 = scalar_lea.vmem %s189_s29, 128  ;;  %s902_s25 = smov [#allocation2]  }
  0x25   : > { %p734_p9 = scmp.ne.s32.totalorder %s189_s29, %s733_s17  ;;  %s738_s26 = sshll.u32 %s902_s25, 4  ;;  %s739_s26 = int_to_ptr.vmem [resolvable:$false] %s738_s26 }
  0x26   : > { %s740_s28 = scalar_lea.vmem %s739_s26, 256  ;;  %p741_p3 = scmp.lt.s32.totalorder %s189_s29, %s739_s26 }
  0x27   : > { %p736_p10 = pnand %p734_p9, %p722_p4  ;;  %p742_p13 = scmp.lt.s32.totalorder %s740_s28, %s733_s17 }
  0x29   : > { %p737_p11 = pneg %p736_p10  ;;  %p743_p12 = por %p742_p13, %p741_p3 }
  0x2b   : > { %p744_p6 = pnand %p743_p12, %p737_p11 }
  0x2d   : > { %747 = shalt.err (!%p744_p6)
}
  0x2e   : > { %s1216_s5 = smov 64   ;;  %s1217_s17 = smov 4  }
  0x2f   : > { %607 = dma.hbm_to_vmem [thread:$0]  (!%p1059_p1), %s187_s23, 128, %s189_s29, %s174_s11, %s1216_s5, %s1216_s5, %s1217_s17  }
  0x30   : > { %p217_p3 = scmp.lt.s32.totalorder %s900_s22, 9  ;;  %s80_s8 = sadd.s32 1, %s868_s14 }
  0x31   : > { %p87_p13 = scmp.ne.s32.totalorder %s868_s14, %s864_s13  ;;  %p1231_p4 = scmp.eq.s32.totalorder %s900_s22, 0 }
  0x32   : > { %p1074_p12 = pnand %p546_p2, %p217_p3  ;;  %p93_p10 = scmp.ne.s32.totalorder %s864_s13, %s860_s12 }
  0x33   : > { %s1084_s9 = scalar_select %p1029_p8, %s868_s14, %s80_s8  }
  0x34   : > { %p89_p9 = por %p87_p13, %p1231_p4  ;;  %s198_s24 = sand.u32 1, %s868_s14  }
  0x35   : > { %s567_s20 = sshll.u32 %s896_s21, 10  ;;  %p1094_p11 = por %p93_p10, %p1002_p5 }
  0x36   : > { %s543_s11 = sshll.u32 %s198_s24, 6  ;;  %s208_s26 = scalar_lea.hbm %s1207_s1, %s567_s20 }
  0x37   : > { %p1103_p1 = pnand %p615_p0, %p89_p9  ;;  %s202_s28 = scalar_lea.vmem [#allocation5], %s543_s11 }
  0x38   : > { %s209_s12 = sshll.u32 %s202_s28, 4  ;;  %s199_s8 = scalar_lea.sflag [#allocation6], %s198_s24  ;;  %s210_s12 = int_to_ptr.vmem [resolvable:$true] %s209_s12 }
  0x39   : > { %p750_p5 = pneg %p1103_p1  ;;  %s761_s4 = scalar_lea.vmem %s210_s12, 1024 }
  0x3a   : > { %p762_p8 = scmp.ne.s32.totalorder %s210_s12, %s761_s4  ;;  %s905_s5 = smov [#allocation5]  }
  0x3b   : > { %s766_s17 = sshll.u32 %s905_s5, 4  ;;  %s767_s17 = int_to_ptr.vmem [resolvable:$false] %s766_s17 }
  0x3c   : > { %p764_p2 = pnand %p762_p8, %p750_p5  ;;  %s768_s20 = scalar_lea.vmem %s767_s17, 2048 }
  0x3d   : > { %p769_p3 = scmp.lt.s32.totalorder %s210_s12, %s767_s17  ;;  %p770_p0 = scmp.lt.s32.totalorder %s768_s20, %s761_s4 }
  0x3e   : > { %p765_p6 = pneg %p764_p2 }
  0x3f   : > { %p771_p13 = por %p770_p0, %p769_p3 }
  0x41   : > { %p772_p4 = pnand %p771_p13, %p765_p6 }
  0x43   : > { %775 = shalt.err (!%p772_p4)
}
  0x44   : > { %s1234_s11 = smov 4   ;;  %s1235_s23 = smov 64  }
  0x45   : > { %610 = dma.hbm_to_vmem [thread:$0]  (!%p1103_p1), %s208_s26, 1024, %s210_s12, %s199_s8, %s1235_s23, %s1235_s23, %s1234_s11  }
  0x46   : > { %221 = sbr.rel (%p1074_p12) target bundleno = 326 (0x146), region = 32  ;;  %s1117_s24 = sand.u32 (!%p1074_p12), 1, %s876_s16  }
  0x47   : > { %s547_s5 = sshll.u32 (!%p1074_p12), %s1117_s24, 3  ;;  %s224_s17 = scalar_lea.sflag (!%p1074_p12), [#allocation3], %s1117_s24 }
  0x48   : > { %s1121_s29 = scalar_lea.vmem (!%p1074_p12), [#allocation2], %s547_s5 }
  0x4b   : > { %847 = dma.done.wait (%p1022_p7), %s224_s17, 128  }
  0x4c   : > { %849 = vsyncadd (%p1022_p7), %s224_s17, 4294967168  ;;  %s232_s26 = sand.u32 1, %s864_s13  }
  0x4d   : > { %s548_s7 = sshll.u32 %s232_s26, 6  ;;  %s233_s10 = scalar_lea.sflag [#allocation6], %s232_s26 }
  0x4e   : > { %s236_s28 = scalar_lea.vmem [#allocation5], %s548_s7 }
  0x4f   : > { %851 = dma.done.wait (%p1094_p11), %s233_s10, 1024  }
  0x50   : > { %853 = vsyncadd (%p1094_p11), %s233_s10, 4294966272  ;;  %v906_v0 = vmov 0.0   ;;  %vm907_vm0 = vmmov 0   ;;  %v711_v1 = vld [vmem:[%s236_s28 + $0x38] sm:$0xff]   ;;  %v712_v2 = vld [vmem:[%s236_s28 + $0x30] sm:$0xff]   ;;  %s561_s6 = sshll.u32 %s884_s18, 2 }
  0x51   : > { %578 = vmatprep.subr.bf16.mxu0 %v906_v0  ;;  %594 = vmatprep.mubr.msk.bf16.mxu0 %vm907_vm0, %v906_v0  ;;  %v713_v3 = vld [vmem:[%s236_s28 + $0x28] sm:$0xff]   ;;  %v714_v4 = vld [vmem:[%s236_s28 + $0x20] sm:$0xff]   ;;  %v715_v5 = vld [vmem:[%s236_s28 + $0x18] sm:$0xff]   ;;  %s549_s25 = sshll.u32 %s1117_s24, 4  ;;  %s402_s4 = sadd.s32 %s888_s19, %s561_s6 }
  0x52   : > { %579 = vmatpush3.bf16.msra.mxu0 %v711_v1  ;;  %v716_v6 = vld [vmem:[%s236_s28 + $0x10] sm:$0xff]   ;;  %v717_v7 = vld [vmem:[%s236_s28 + $0x8] sm:$0xff]   ;;  %v718_v8 = vld [vmem:[%s236_s28] sm:$0xff]   ;;  %s263_s20 = scalar_lea.vmem [#allocation7], %s549_s25  ;;  %s568_s23 = sshll.u32 %s402_s4, 8 }
  0x53   : > { %580 = vmatprep.subr.bf16.mxu0 %v906_v0  ;;  %v719_v9 = vld [vmem:[%s1121_s29] sm:$0xff]   ;;  %s411_s11 = sshll.u32 %s263_s20, 4  ;;  %s1144_s17 = scalar_lea.hbm %s1209_s3, %s568_s23  ;;  %s1139_s11 = int_to_ptr.vmem [resolvable:$true] %s411_s11 }
  0x54   : > { %v550_v10 = vld [vmem:[%s1208_s2] ss:$0 sm:$0xff]  ;;  %s394_s19 = scalar_lea.sflag [#allocation4], %s1117_s24  ;;  %s776_s29 = scalar_lea.vmem %s1139_s11, 256 }
  0x55   : > { %p777_p7 = scmp.ne.s32.totalorder %s1139_s11, %s776_s29  ;;  %p1236_p12 = scmp.ne.s32.totalorder %s1227_s27, 0 }
  0x56   : > { %581 = vmatpush3.bf16.msra.mxu0 %v712_v2  ;;  %s908_s26 = smov [#allocation7]  }
  0x57   : > { %582 = vmatprep.subr.bf16.mxu0 %v906_v0  ;;  %p778_p9 = pnand %p777_p7, %p1236_p12  ;;  %s780_s7 = sshll.u32 %s908_s26, 4  ;;  %s781_s7 = int_to_ptr.vmem [resolvable:$false] %s780_s7 }
  0x58   : > { %s782_s10 = scalar_lea.vmem %s781_s7, 512  ;;  %p783_p11 = scmp.lt.s32.totalorder %s1139_s11, %s781_s7 }
  0x59   : > { %p779_p10 = pneg %p778_p9  ;;  %p784_p1 = scmp.lt.s32.totalorder %s782_s10, %s776_s29 }
  0x5a   : > { %583 = vmatpush3.bf16.msra.mxu0 %v713_v3 }
  0x5b   : > { %584 = vmatprep.subr.bf16.mxu0 %v906_v0  ;;  %p785_p5 = por %p784_p1, %p783_p11 }
  0x5d   : > { %p786_p8 = pnand %p785_p5, %p779_p10 }
  0x5e   : > { %585 = vmatpush3.bf16.msra.mxu0 %v714_v4 }
  0x5f   : > { %586 = vmatprep.subr.bf16.mxu0 %v906_v0 }
  0x62   : > { %587 = vmatpush3.bf16.msra.mxu0 %v715_v5 }
  0x63   : > { %588 = vmatprep.subr.bf16.mxu0 %v906_v0 }
  0x66   : > { %589 = vmatpush3.bf16.msra.mxu0 %v716_v6 }
  0x67   : > { %590 = vmatprep.subr.bf16.mxu0 %v906_v0 }
  0x6a   : > { %591 = vmatpush3.bf16.msra.mxu0 %v717_v7 }
  0x6b   : > { %592 = vmatprep.subr.bf16.mxu0 %v906_v0 }
  0x6e   : > { %593 = vmatpush3.bf16.msra.mxu0 %v718_v8 }
  0x71   : > { %595 = vmatmul.mubr.bf16.vlgmr.msra.gmra.mxu0 %v719_v9 }
 0x131   : > { %v384_v11 = vpop.f32.mrf.mxu0 }
 0x132   : > { %v385_v12 = vadd.f32 %v550_v10, %v384_v11 }
 0x133   : > { %v596_v13 = vpop.f32.mrf.mxu0 }
 0x134   : > { %391 = vst [vmem:[%s263_s20] sm:$0xff] %v385_v12 }
 0x135   : > { %v387_v14 = vpop.f32.mrf.mxu0 }
 0x136   : > { %v388_v15 = vadd.f32 %v550_v10, %v387_v14 }
 0x137   : > { %v597_v16 = vpop.f32.mrf.mxu0 }
 0x138   : > { %392 = vst [vmem:[%s263_s20 + $0x8] sm:$0xff] %v388_v15 }
 0x139   : > { %789 = shalt.err (!%p786_p8)
}
 0x13a   : > { %s790_s28 = scalar_lea.hbm %s1144_s17, 256  ;;  %s794_s12 = scalar_lea.hbm %s1209_s3, 2048 }
 0x13b   : > { %p791_p2 = scmp.ne.s32.totalorder %s1144_s17, %s790_s28  ;;  %p795_p0 = scmp.lt.s32.totalorder %s1144_s17, %s1209_s3 }
 0x13c   : > { %p796_p13 = scmp.lt.s32.totalorder %s794_s12, %s790_s28 }
 0x13d   : > { %p792_p6 = pnand %p791_p2, %p1236_p12 }
 0x13e   : > { %p797_p4 = por %p796_p13, %p795_p0 }
 0x13f   : > { %p793_p3 = pneg %p792_p6 }
 0x141   : > { %p798_p7 = pnand %p797_p4, %p793_p3 }
 0x143   : > { %801 = shalt.err (!%p798_p7)
}
 0x144   : > { %s909_s20 = smov 128   ;;  %s910_s23 = smov 8  }
 0x145   : > { %602 = dma.vmem_to_hbm [thread:$0]  (%p1236_p12), %s1139_s11, 256, %s1144_s17, %s394_s19, %s909_s20, %s909_s20, %s910_s23  }
 0x146 PF: > { %p616_p9 = scmp.ge.s32.totalorder %s900_s22, 2  ;;  %s426_s18 = sand.u32 1, %s872_s15  }
 0x147   : > { %p1237_p10 = scmp.ne.s32.totalorder %s1228_s30, 0  ;;  %s427_s5 = scalar_lea.sflag [#allocation4], %s426_s18 }
 0x149   : > { %p612_p11 = pnand %p616_p9, %p1237_p10 }
 0x14b   : > { %p613_p1 = pneg %p612_p11 }
 0x14d   : > { %855 = dma.done.wait (%p613_p1), %s427_s5, 256  }
 0x14e   : > { %857 = vsyncadd (%p613_p1), %s427_s5, 4294967040  ;;  %s22_s22 = sadd.s32 1, %s900_s22   ;;  %s1238_s27 = sld [smem:[#allocation11_spill]] }
 0x14f   : > { %p19_p5 = scmp.ge.s32.totalorder %s22_s22, 10   ;;  %s1239_s17 = sld [smem:[#allocation15_spill]] }
 0x150   : > { %s1240_s18 = sld [smem:[#allocation12_spill]]  ;;  %s1243_s12 = smov %s864_s13 }
 0x151   : > { %s1241_s20 = sld [smem:[#allocation13_spill]]  ;;  %s1244_s13 = smov %s868_s14 }
 0x152   : > { %s1242_s24 = sld [smem:[#allocation14_spill]]  ;;  %s1245_s14 = smov %s1084_s9 }
 0x153   : > { %s1246_s15 = smov %s876_s16  ;;  %s1248_s19 = smov %s896_s21 }
 0x154   : > { %s1247_s16 = smov %s1238_s27  ;;  %21 = sbr.rel (!%p19_p5) target bundleno = 11 (0xb), region = 90 }
 0x158   : > { %s1249_s21 = smov %s1242_s24 }
 0x159   :  { %432 = vsyncpa [#allocation3], 1 }
 0x15a   :  { %434 = vsyncpa [#allocation3 + $0x1], 1 }
 0x15b   :  { %435 = vsyncpa [#allocation6], 1 }
 0x15c   :  { %437 = vsyncpa [#allocation6 + $0x1], 1 }
 0x15d   :  { %438 = vsyncpa [#allocation4], 1 }
 0x15e   :  { %440 = vsyncpa [#allocation4 + $0x1], 1 }

</bundles_post_ra>
